<compile_context>
chip_gen: v7x
topology: tpu7x:2x2x1
jax: 0.10.0
libtpu: 0.0.40
codegen_flags: <defaults>
</compile_context>

<pallas_src>
import jax
import jax.numpy as jnp
from jax import lax
from jax.experimental import pallas as pl
from jax.experimental.pallas import tpu as pltpu


def _round_up(n, m):
    return (n + m - 1) // m * m


def rnn_kernel(x_ref, w_in_ref, b_ref, w_rec_ref, w_fc_ref, b_fc_ref,
               out_ref, xp_ref):
    # x_ref: (T, B, I)  -- time-major so timestep t is a leading-axis slice
    T, B, I = x_ref.shape
    H = w_rec_ref.shape[0]

    # --- hoisted, non-recurrent input projection: one big matmul ------------
    x_flat = x_ref[...].reshape(T * B, I)
    xp = (jnp.dot(x_flat, w_in_ref[...], preferred_element_type=jnp.float32)
          + b_ref[...])                       # bias = b_in + b_rec, (1, H)
    xp_ref[...] = xp.reshape(T, B, H)

    # --- serial recurrence: h = tanh(x_proj[t] + h @ W_rec) -----------------
    def step(t, h):
        pre = xp_ref[t] + jnp.dot(h, w_rec_ref[...],
                                  preferred_element_type=jnp.float32)
        return jnp.tanh(pre)

    h0 = jnp.zeros((B, H), jnp.float32)
    h = lax.fori_loop(0, T, step, h0, unroll=True)

    # --- final projection, fused and executed once ---------------------------
    out_ref[...] = (jnp.dot(h, w_fc_ref[...], preferred_element_type=jnp.float32)
                    + b_fc_ref[...]).astype(out_ref.dtype)


def custom_rnn_forward(x, w_in, b_in, w_rec, b_rec, w_fc, b_fc):
    """x: (B, T, I); weights stored as (in, out) = PyTorch weight transposed."""
    B, T, I = x.shape
    H = w_in.shape[1]
    O = w_fc.shape[1]

    # Pad to vreg-friendly geometry: 8 sublanes x 128 lanes.
    Bp = _round_up(B, 8)
    Ip = _round_up(I, 128)
    Hp = _round_up(H, 128)
    Op = _round_up(O, 128)

    # Time-major (T, B, I) so timestep t is a contiguous leading-axis slice.
    x_p = jnp.zeros((T, Bp, Ip), jnp.float32).at[:, :B, :I].set(
        jnp.transpose(x, (1, 0, 2)).astype(jnp.float32))
    w_in_p = jnp.zeros((Ip, Hp), jnp.float32).at[:I, :H].set(w_in)
    w_rec_p = jnp.zeros((Hp, Hp), jnp.float32).at[:H, :H].set(w_rec)
    w_fc_p = jnp.zeros((Hp, Op), jnp.float32).at[:H, :O].set(w_fc)
    b_p = jnp.zeros((1, Hp), jnp.float32).at[0, :H].set(b_in + b_rec)
    b_fc_p = jnp.zeros((1, Op), jnp.float32).at[0, :O].set(b_fc)

    out_p = pl.pallas_call(
        rnn_kernel,
        out_shape=jax.ShapeDtypeStruct((Bp, Op), jnp.float32),
        in_specs=[pl.BlockSpec(memory_space=pltpu.MemorySpace.VMEM)
                  for _ in range(6)],
        out_specs=pl.BlockSpec(memory_space=pltpu.MemorySpace.VMEM),
        scratch_shapes=[pltpu.VMEM((T, Bp, Hp), jnp.float32)],  # x_proj buffer
    )(x_p, w_in_p, b_p, w_rec_p, w_fc_p, b_fc_p)

    return out_p[:B, :O]


def reference_forward(x, w_in, b_in, w_rec, b_rec, w_fc, b_fc):
    B, T, _ = x.shape
    H = w_in.shape[1]
    h = jnp.zeros((B, H), jnp.float32)
    for t in range(T):
        h = jnp.tanh(x[:, t, :] @ w_in + b_in + h @ w_rec + b_rec)
    return h @ w_fc + b_fc


if __name__ == "__main__":
    # Module hyperparameters (small, consistent with the PyTorch forward).
    batch, seq, input_size, hidden_size, output_size = 2, 8, 16, 32, 8

    key = jax.random.PRNGKey(0)
    keys = jax.random.split(key, 8)

    # Deterministic synthetic parameters, mimicking nn.Linear uniform init.
    def init_linear(kw, kb, fan_in, fan_out):
        bound = 1.0 / jnp.sqrt(fan_in)
        # stored as (in, out) — i.e. PyTorch weight (out, in) transposed
        w = jax.random.uniform(kw, (fan_in, fan_out), jnp.float32, -bound, bound)
        b = jax.random.uniform(kb, (fan_out,), jnp.float32, -bound, bound)
        return w, b

    w_in, b_in = init_linear(keys[0], keys[1], input_size, hidden_size)
    w_rec, b_rec = init_linear(keys[2], keys[3], hidden_size, hidden_size)
    w_fc, b_fc = init_linear(keys[4], keys[5], hidden_size, output_size)

    x = jax.random.normal(keys[6], (batch, seq, input_size), jnp.float32)

    forward = jax.jit(custom_rnn_forward)
    out = forward(x, w_in, b_in, w_rec, b_rec, w_fc, b_fc)
    out = jax.block_until_ready(out)

    ref = reference_forward(x, w_in, b_in, w_rec, b_rec, w_fc, b_fc)
    assert out.shape == (batch, output_size)
    assert jnp.allclose(out, ref, atol=1e-5, rtol=1e-5), "mismatch vs reference"

    print("KERNEL_OK")
</pallas_src>

<mosaic_0001>
module attributes {stable_mosaic.version = 11 : i64} {
  func.func @rnn_kernel(%arg0: memref<8x8x128xf32, #tpu.memory_space<vmem>>, %arg1: memref<128x128xf32, #tpu.memory_space<vmem>>, %arg2: memref<1x128xf32, #tpu.memory_space<vmem>>, %arg3: memref<128x128xf32, #tpu.memory_space<vmem>>, %arg4: memref<128x128xf32, #tpu.memory_space<vmem>>, %arg5: memref<1x128xf32, #tpu.memory_space<vmem>>, %arg6: memref<8x128xf32, #tpu.memory_space<vmem>>, %arg7: memref<8x8x128xf32, #tpu.memory_space<vmem>>) attributes {dimension_semantics = [], scalar_prefetch = 0 : i64, scratch_operands = 1 : i64, tpu.core_type = #tpu.core_type<tc>} {
    %c0 = arith.constant 0 : index
    %c0_0 = arith.constant 0 : index
    %c0_1 = arith.constant 0 : index
    %0 = vector.load %arg0[%c0, %c0_0, %c0_1] : memref<8x8x128xf32, #tpu.memory_space<vmem>>, vector<8x8x128xf32>
    %1 = vector.shape_cast %0 : vector<8x8x128xf32> to vector<64x128xf32>
    %c0_2 = arith.constant 0 : index
    %c0_3 = arith.constant 0 : index
    %2 = vector.load %arg1[%c0_2, %c0_3] : memref<128x128xf32, #tpu.memory_space<vmem>>, vector<128x128xf32>
    %cst = arith.constant dense<0.000000e+00> : vector<64x128xf32>
    %3 = tpu.matmul %1, %2, %cst {dimension_numbers = #tpu.dot_dimension_numbers<[1], [0], [0], [1], [0, 0, 1, 1], [], []>} : vector<64x128xf32>, vector<128x128xf32>, vector<64x128xf32> -> vector<64x128xf32>
    %c0_4 = arith.constant 0 : index
    %c0_5 = arith.constant 0 : index
    %4 = vector.load %arg2[%c0_4, %c0_5] : memref<1x128xf32, #tpu.memory_space<vmem>>, vector<1x128xf32>
    %5 = vector.broadcast %4 : vector<1x128xf32> to vector<64x128xf32>
    %6 = arith.addf %3, %5 : vector<64x128xf32>
    %7 = vector.shape_cast %6 : vector<64x128xf32> to vector<8x8x128xf32>
    %c0_6 = arith.constant 0 : index
    %c0_7 = arith.constant 0 : index
    %c0_8 = arith.constant 0 : index
    %8 = vector.load %arg7[%c0_6, %c0_7, %c0_8] : memref<8x8x128xf32, #tpu.memory_space<vmem>>, vector<8x8x128xf32>
    tpu.vector_store %arg7[%c0_6, %c0_7, %c0_8], %7 {strides = array<i32>} : memref<8x8x128xf32, #tpu.memory_space<vmem>>, vector<8x8x128xf32>,
    %cst_9 = arith.constant 0.000000e+00 : f32
    %9 = vector.broadcast %cst_9 : f32 to vector<8x128xf32>
    %c0_i32 = arith.constant 0 : i32
    %10 = arith.index_cast %c0_i32 : i32 to index
    %c0_10 = arith.constant 0 : index
    %c0_11 = arith.constant 0 : index
    %11 = vector.load %arg7[%10, %c0_10, %c0_11] : memref<8x8x128xf32, #tpu.memory_space<vmem>>, vector<1x8x128xf32>
    %12 = vector.shape_cast %11 : vector<1x8x128xf32> to vector<8x128xf32>
    %c0_12 = arith.constant 0 : index
    %c0_13 = arith.constant 0 : index
    %13 = vector.load %arg3[%c0_12, %c0_13] : memref<128x128xf32, #tpu.memory_space<vmem>>, vector<128x128xf32>
    %cst_14 = arith.constant dense<0.000000e+00> : vector<8x128xf32>
    %14 = tpu.matmul %9, %13, %cst_14 {dimension_numbers = #tpu.dot_dimension_numbers<[1], [0], [0], [1], [0, 0, 1, 1], [], []>} : vector<8x128xf32>, vector<128x128xf32>, vector<8x128xf32> -> vector<8x128xf32>
    %15 = arith.addf %12, %14 : vector<8x128xf32>
    %16 = math.tanh %15 : vector<8x128xf32>
    %c1_i32 = arith.constant 1 : i32
    %17 = arith.index_cast %c1_i32 : i32 to index
    %c0_15 = arith.constant 0 : index
    %c0_16 = arith.constant 0 : index
    %18 = vector.load %arg7[%17, %c0_15, %c0_16] : memref<8x8x128xf32, #tpu.memory_space<vmem>>, vector<1x8x128xf32>
    %19 = vector.shape_cast %18 : vector<1x8x128xf32> to vector<8x128xf32>
    %c0_17 = arith.constant 0 : index
    %c0_18 = arith.constant 0 : index
    %20 = vector.load %arg3[%c0_17, %c0_18] : memref<128x128xf32, #tpu.memory_space<vmem>>, vector<128x128xf32>
    %cst_19 = arith.constant dense<0.000000e+00> : vector<8x128xf32>
    %21 = tpu.matmul %16, %20, %cst_19 {dimension_numbers = #tpu.dot_dimension_numbers<[1], [0], [0], [1], [0, 0, 1, 1], [], []>} : vector<8x128xf32>, vector<128x128xf32>, vector<8x128xf32> -> vector<8x128xf32>
    %22 = arith.addf %19, %21 : vector<8x128xf32>
    %23 = math.tanh %22 : vector<8x128xf32>
    %c2_i32 = arith.constant 2 : i32
    %24 = arith.index_cast %c2_i32 : i32 to index
    %c0_20 = arith.constant 0 : index
    %c0_21 = arith.constant 0 : index
    %25 = vector.load %arg7[%24, %c0_20, %c0_21] : memref<8x8x128xf32, #tpu.memory_space<vmem>>, vector<1x8x128xf32>
    %26 = vector.shape_cast %25 : vector<1x8x128xf32> to vector<8x128xf32>
    %c0_22 = arith.constant 0 : index
    %c0_23 = arith.constant 0 : index
    %27 = vector.load %arg3[%c0_22, %c0_23] : memref<128x128xf32, #tpu.memory_space<vmem>>, vector<128x128xf32>
    %cst_24 = arith.constant dense<0.000000e+00> : vector<8x128xf32>
    %28 = tpu.matmul %23, %27, %cst_24 {dimension_numbers = #tpu.dot_dimension_numbers<[1], [0], [0], [1], [0, 0, 1, 1], [], []>} : vector<8x128xf32>, vector<128x128xf32>, vector<8x128xf32> -> vector<8x128xf32>
    %29 = arith.addf %26, %28 : vector<8x128xf32>
    %30 = math.tanh %29 : vector<8x128xf32>
    %c3_i32 = arith.constant 3 : i32
    %31 = arith.index_cast %c3_i32 : i32 to index
    %c0_25 = arith.constant 0 : index
    %c0_26 = arith.constant 0 : index
    %32 = vector.load %arg7[%31, %c0_25, %c0_26] : memref<8x8x128xf32, #tpu.memory_space<vmem>>, vector<1x8x128xf32>
    %33 = vector.shape_cast %32 : vector<1x8x128xf32> to vector<8x128xf32>
    %c0_27 = arith.constant 0 : index
    %c0_28 = arith.constant 0 : index
    %34 = vector.load %arg3[%c0_27, %c0_28] : memref<128x128xf32, #tpu.memory_space<vmem>>, vector<128x128xf32>
    %cst_29 = arith.constant dense<0.000000e+00> : vector<8x128xf32>
    %35 = tpu.matmul %30, %34, %cst_29 {dimension_numbers = #tpu.dot_dimension_numbers<[1], [0], [0], [1], [0, 0, 1, 1], [], []>} : vector<8x128xf32>, vector<128x128xf32>, vector<8x128xf32> -> vector<8x128xf32>
    %36 = arith.addf %33, %35 : vector<8x128xf32>
    %37 = math.tanh %36 : vector<8x128xf32>
    %c4_i32 = arith.constant 4 : i32
    %38 = arith.index_cast %c4_i32 : i32 to index
    %c0_30 = arith.constant 0 : index
    %c0_31 = arith.constant 0 : index
    %39 = vector.load %arg7[%38, %c0_30, %c0_31] : memref<8x8x128xf32, #tpu.memory_space<vmem>>, vector<1x8x128xf32>
    %40 = vector.shape_cast %39 : vector<1x8x128xf32> to vector<8x128xf32>
    %c0_32 = arith.constant 0 : index
    %c0_33 = arith.constant 0 : index
    %41 = vector.load %arg3[%c0_32, %c0_33] : memref<128x128xf32, #tpu.memory_space<vmem>>, vector<128x128xf32>
    %cst_34 = arith.constant dense<0.000000e+00> : vector<8x128xf32>
    %42 = tpu.matmul %37, %41, %cst_34 {dimension_numbers = #tpu.dot_dimension_numbers<[1], [0], [0], [1], [0, 0, 1, 1], [], []>} : vector<8x128xf32>, vector<128x128xf32>, vector<8x128xf32> -> vector<8x128xf32>
    %43 = arith.addf %40, %42 : vector<8x128xf32>
    %44 = math.tanh %43 : vector<8x128xf32>
    %c5_i32 = arith.constant 5 : i32
    %45 = arith.index_cast %c5_i32 : i32 to index
    %c0_35 = arith.constant 0 : index
    %c0_36 = arith.constant 0 : index
    %46 = vector.load %arg7[%45, %c0_35, %c0_36] : memref<8x8x128xf32, #tpu.memory_space<vmem>>, vector<1x8x128xf32>
    %47 = vector.shape_cast %46 : vector<1x8x128xf32> to vector<8x128xf32>
    %c0_37 = arith.constant 0 : index
    %c0_38 = arith.constant 0 : index
    %48 = vector.load %arg3[%c0_37, %c0_38] : memref<128x128xf32, #tpu.memory_space<vmem>>, vector<128x128xf32>
    %cst_39 = arith.constant dense<0.000000e+00> : vector<8x128xf32>
    %49 = tpu.matmul %44, %48, %cst_39 {dimension_numbers = #tpu.dot_dimension_numbers<[1], [0], [0], [1], [0, 0, 1, 1], [], []>} : vector<8x128xf32>, vector<128x128xf32>, vector<8x128xf32> -> vector<8x128xf32>
    %50 = arith.addf %47, %49 : vector<8x128xf32>
    %51 = math.tanh %50 : vector<8x128xf32>
    %c6_i32 = arith.constant 6 : i32
    %52 = arith.index_cast %c6_i32 : i32 to index
    %c0_40 = arith.constant 0 : index
    %c0_41 = arith.constant 0 : index
    %53 = vector.load %arg7[%52, %c0_40, %c0_41] : memref<8x8x128xf32, #tpu.memory_space<vmem>>, vector<1x8x128xf32>
    %54 = vector.shape_cast %53 : vector<1x8x128xf32> to vector<8x128xf32>
    %c0_42 = arith.constant 0 : index
    %c0_43 = arith.constant 0 : index
    %55 = vector.load %arg3[%c0_42, %c0_43] : memref<128x128xf32, #tpu.memory_space<vmem>>, vector<128x128xf32>
    %cst_44 = arith.constant dense<0.000000e+00> : vector<8x128xf32>
    %56 = tpu.matmul %51, %55, %cst_44 {dimension_numbers = #tpu.dot_dimension_numbers<[1], [0], [0], [1], [0, 0, 1, 1], [], []>} : vector<8x128xf32>, vector<128x128xf32>, vector<8x128xf32> -> vector<8x128xf32>
    %57 = arith.addf %54, %56 : vector<8x128xf32>
    %58 = math.tanh %57 : vector<8x128xf32>
    %c7_i32 = arith.constant 7 : i32
    %59 = arith.index_cast %c7_i32 : i32 to index
    %c0_45 = arith.constant 0 : index
    %c0_46 = arith.constant 0 : index
    %60 = vector.load %arg7[%59, %c0_45, %c0_46] : memref<8x8x128xf32, #tpu.memory_space<vmem>>, vector<1x8x128xf32>
    %61 = vector.shape_cast %60 : vector<1x8x128xf32> to vector<8x128xf32>
    %c0_47 = arith.constant 0 : index
    %c0_48 = arith.constant 0 : index
    %62 = vector.load %arg3[%c0_47, %c0_48] : memref<128x128xf32, #tpu.memory_space<vmem>>, vector<128x128xf32>
    %cst_49 = arith.constant dense<0.000000e+00> : vector<8x128xf32>
    %63 = tpu.matmul %58, %62, %cst_49 {dimension_numbers = #tpu.dot_dimension_numbers<[1], [0], [0], [1], [0, 0, 1, 1], [], []>} : vector<8x128xf32>, vector<128x128xf32>, vector<8x128xf32> -> vector<8x128xf32>
    %64 = arith.addf %61, %63 : vector<8x128xf32>
    %65 = math.tanh %64 : vector<8x128xf32>
    %c8_i32 = arith.constant 8 : i32
    %c0_50 = arith.constant 0 : index
    %c0_51 = arith.constant 0 : index
    %66 = vector.load %arg4[%c0_50, %c0_51] : memref<128x128xf32, #tpu.memory_space<vmem>>, vector<128x128xf32>
    %cst_52 = arith.constant dense<0.000000e+00> : vector<8x128xf32>
    %67 = tpu.matmul %65, %66, %cst_52 {dimension_numbers = #tpu.dot_dimension_numbers<[1], [0], [0], [1], [0, 0, 1, 1], [], []>} : vector<8x128xf32>, vector<128x128xf32>, vector<8x128xf32> -> vector<8x128xf32>
    %c0_53 = arith.constant 0 : index
    %c0_54 = arith.constant 0 : index
    %68 = vector.load %arg5[%c0_53, %c0_54] : memref<1x128xf32, #tpu.memory_space<vmem>>, vector<1x128xf32>
    %69 = vector.broadcast %68 : vector<1x128xf32> to vector<8x128xf32>
    %70 = arith.addf %67, %69 : vector<8x128xf32>
    %c0_55 = arith.constant 0 : index
    %c0_56 = arith.constant 0 : index
    %71 = vector.load %arg6[%c0_55, %c0_56] : memref<8x128xf32, #tpu.memory_space<vmem>>, vector<8x128xf32>
    tpu.vector_store %arg6[%c0_55, %c0_56], %70 {strides = array<i32>} : memref<8x128xf32, #tpu.memory_space<vmem>>, vector<8x128xf32>,
    return
  }
}

</mosaic_0001>

<bundles_post_ra>
// kernel: custom_rnn_forward.1
= control target key start
LH: loop header
LB: loop body
LE: loop exit
PB: predicated region body
PF: predicated region fallthrough
CT: control target
= control target key end

     0   :  { %v1677_v2 = vmov 0.0|0.0   ;;  %vm1678_vm0 = vmmov 0   ;;  %v1679_v4 = vmov 0.0   ;;  %s2085_s1 = inlined_call_operand.vmem [shape: f32[128,128], index: 1, kind: input, shape index: {}]   ;;  %s2086_s3 = inlined_call_operand.vmem [shape: f32[128,128], index: 3, kind: input, shape index: {}]   ;;  %s2087_s0 = inlined_call_operand.vmem [shape: f32[8,8,128], index: 0, kind: input, shape index: {}]   ;;  %s2088_s2 = inlined_call_operand.vmem [shape: f32[1,128], index: 2, kind: input, shape index: {}]   ;;  %s2089_s4 = inlined_call_operand.vmem [shape: f32[128,128], index: 4, kind: input, shape index: {}]   ;;  %s2090_s5 = inlined_call_operand.vmem [shape: f32[1,128], index: 5, kind: input, shape index: {}]   ;;  %s2091_s6 = inlined_call_operand.vmem [shape: f32[8,128], index: 6, kind: output, shape index: {}]  }
   0x1   :  { %v31_v0 = vld [vmem:[%s2085_s1] sm:$0xff]  ;;  %v32_v1 = vld [vmem:[%s2085_s1 + $0x8] sm:$0xff]  ;;  %1442 = vmatprep.subr.bf16.mxu1 %v1677_v2  ;;  %1127 = vmatprep.mubr.msk.f32.mxu1 %vm1678_vm0, %v1679_v4  ;;  %v33_v7 = vld [vmem:[%s2085_s1 + $0x10] sm:$0xff] }
   0x2   :  { %v168_v3 = vld [vmem:[%s2086_s3] sm:$0xff]  ;;  %v1410_v5 = vpack.c.bf16 %v32_v1, %v31_v0  ;;  %v169_v6 = vld [vmem:[%s2086_s3 + $0x8] sm:$0xff]  ;;  %v34_v8 = vld [vmem:[%s2085_s1 + $0x18] sm:$0xff] }
   0x3   :  { %v1736_v9 = vpack.c.bf16 %v169_v6, %v168_v3  ;;  %v1414_v10 = vpack.c.bf16 %v34_v8, %v33_v7  ;;  %v170_v11 = vld [vmem:[%s2086_s3 + $0x10] sm:$0xff]  ;;  %v171_v12 = vld [vmem:[%s2086_s3 + $0x18] sm:$0xff]  ;;  %v35_v13 = vld [vmem:[%s2085_s1 + $0x20] sm:$0xff] }
   0x4   :  { %1411 = vmatprep.subr.bf16.mxu0 %v1410_v5  ;;  %v36_v14 = vld [vmem:[%s2085_s1 + $0x28] sm:$0xff]  ;;  %v1751_v15 = vpack.c.bf16 %v171_v12, %v170_v11  ;;  %v172_v17 = vld [vmem:[%s2086_s3 + $0x20] sm:$0xff]  ;;  %v37_v19 = vld [vmem:[%s2085_s1 + $0x30] sm:$0xff] }
   0x5   :  { %1413 = vmatpush3.bf16.msra.mxu0 %v1410_v5  ;;  %1444 = vmatpush3.bf16.msra.mxu1 %v1736_v9  ;;  %v1418_v16 = vpack.c.bf16 %v36_v14, %v35_v13  ;;  %v173_v18 = vld [vmem:[%s2086_s3 + $0x28] sm:$0xff]  ;;  %v38_v20 = vld [vmem:[%s2085_s1 + $0x38] sm:$0xff]  ;;  %v174_v23 = vld [vmem:[%s2086_s3 + $0x30] sm:$0xff] }
   0x6   :  { %1415 = vmatprep.subr.bf16.mxu0 %v1414_v10  ;;  %1445 = vmatprep.subr.bf16.mxu1 %v1677_v2  ;;  %v1767_v21 = vpack.c.bf16 %v173_v18, %v172_v17  ;;  %v1422_v22 = vpack.c.bf16 %v38_v20, %v37_v19  ;;  %v175_v24 = vld [vmem:[%s2086_s3 + $0x38] sm:$0xff]  ;;  %v39_v25 = vld [vmem:[%s2085_s1 + $0x40] sm:$0xff]  ;;  %v40_v26 = vld [vmem:[%s2085_s1 + $0x48] sm:$0xff] }
   0x7   :  { %v23_v27 = vld [vmem:[%s2087_s0] sm:$0xff]  ;;  %v1786_v28 = vpack.c.bf16 %v175_v24, %v174_v23  ;;  %v1426_v29 = vpack.c.bf16 %v40_v26, %v39_v25  ;;  %v177_v31 = vld [vmem:[%s2086_s3 + $0x48] sm:$0xff]  ;;  %v41_v32 = vld [vmem:[%s2085_s1 + $0x50] sm:$0xff] }
   0x8   :  { %1083 = vmatprep.mubr.f32.mxu0 %v23_v27  ;;  %v176_v30 = vld [vmem:[%s2086_s3 + $0x40] sm:$0xff]  ;;  %v42_v33 = vld [vmem:[%s2085_s1 + $0x58] sm:$0xff]  ;;  %v178_v36 = vld [vmem:[%s2086_s3 + $0x50] sm:$0xff] }
   0x9   :  { %1417 = vmatpush3.bf16.msra.mxu0 %v1414_v10  ;;  %1447 = vmatpush3.bf16.msra.mxu1 %v1751_v15  ;;  %v1802_v34 = vpack.c.bf16 %v177_v31, %v176_v30  ;;  %v1430_v35 = vpack.c.bf16 %v42_v33, %v41_v32  ;;  %v179_v37 = vld [vmem:[%s2086_s3 + $0x58] sm:$0xff]  ;;  %v43_v38 = vld [vmem:[%s2085_s1 + $0x60] sm:$0xff]  ;;  %v44_v39 = vld [vmem:[%s2085_s1 + $0x68] sm:$0xff] }
   0xa   :  { %1419 = vmatprep.subr.bf16.mxu0 %v1418_v16  ;;  %1448 = vmatprep.subr.bf16.mxu1 %v1677_v2  ;;  %v1818_v40 = vpack.c.bf16 %v179_v37, %v178_v36  ;;  %v1434_v41 = vpack.c.bf16 %v44_v39, %v43_v38  ;;  %v180_v42 = vld [vmem:[%s2086_s3 + $0x60] sm:$0xff]  ;;  %v181_v43 = vld [vmem:[%s2086_s3 + $0x68] sm:$0xff]  ;;  %v45_v44 = vld [vmem:[%s2085_s1 + $0x70] sm:$0xff] }
   0xb   :  { %v46_v45 = vld [vmem:[%s2085_s1 + $0x78] sm:$0xff]  ;;  %v1834_v46 = vpack.c.bf16 %v181_v43, %v180_v42  ;;  %v182_v48 = vld [vmem:[%s2086_s3 + $0x70] sm:$0xff]  ;;  %v24_v51 = vld [vmem:[%s2087_s0 + $0x8] sm:$0xff] }
   0xc   :  { %v1438_v47 = vpack.c.bf16 %v46_v45, %v45_v44  ;;  %v183_v49 = vld [vmem:[%s2086_s3 + $0x78] sm:$0xff]  ;;  %v25_v52 = vld [vmem:[%s2087_s0 + $0x10] sm:$0xff]  ;;  %v27_v54 = vld [vmem:[%s2087_s0 + $0x20] sm:$0xff] }
   0xd   :  { %1421 = vmatpush3.bf16.msra.mxu0 %v1418_v16  ;;  %1450 = vmatpush3.bf16.msra.mxu1 %v1767_v21  ;;  %v1844_v50 = vpack.c.bf16 %v183_v49, %v182_v48  ;;  %v26_v53 = vld [vmem:[%s2087_s0 + $0x18] sm:$0xff]  ;;  %v28_v55 = vld [vmem:[%s2087_s0 + $0x28] sm:$0xff]  ;;  %v29_v56 = vld [vmem:[%s2087_s0 + $0x30] sm:$0xff] }
   0xe   :  { %1423 = vmatprep.subr.bf16.mxu0 %v1422_v22  ;;  %1451 = vmatprep.subr.bf16.mxu1 %v1677_v2  ;;  %v30_v57 = vld [vmem:[%s2087_s0 + $0x38] sm:$0xff]  ;;  %v1911_v58 = vld [vmem:[%s2088_s2] ss:$0 sm:$0xff]  ;;  %v775_v36 = vld [vmem:[%s2089_s4 + $0x8] sm:$0xff] }
   0xf   :  { %v776_v37 = vld [vmem:[%s2089_s4 + $0x10] sm:$0xff]  ;;  %v777_v39 = vld [vmem:[%s2089_s4 + $0x18] sm:$0xff] }
  0x10   :  { %v780_v43 = vld [vmem:[%s2089_s4 + $0x30] sm:$0xff]  ;;  %v781_v44 = vld [vmem:[%s2089_s4 + $0x38] sm:$0xff] }
  0x11   :  { %1425 = vmatpush3.bf16.msra.mxu0 %v1422_v22  ;;  %1453 = vmatpush3.bf16.msra.mxu1 %v1786_v28  ;;  %v1644_v45 = vpack.c.bf16 %v781_v44, %v780_v43 }
  0x12   :  { %1427 = vmatprep.subr.bf16.mxu0 %v1426_v29  ;;  %1454 = vmatprep.subr.bf16.mxu1 %v1677_v2 }
  0x15   :  { %1429 = vmatpush3.bf16.msra.mxu0 %v1426_v29  ;;  %1456 = vmatpush3.bf16.msra.mxu1 %v1802_v34 }
  0x16   :  { %1431 = vmatprep.subr.bf16.mxu0 %v1430_v35  ;;  %1457 = vmatprep.subr.bf16.mxu1 %v1677_v2 }
  0x19   :  { %1433 = vmatpush3.bf16.msra.mxu0 %v1430_v35  ;;  %1459 = vmatpush3.bf16.msra.mxu1 %v1818_v40  ;;  %v774_v35 = vld [vmem:[%s2089_s4] sm:$0xff] }
  0x1a   :  { %1435 = vmatprep.subr.bf16.mxu0 %v1434_v41  ;;  %1460 = vmatprep.subr.bf16.mxu1 %v1677_v2  ;;  %v1635_v38 = vpack.c.bf16 %v775_v36, %v774_v35 }
  0x1d   :  { %1437 = vmatpush3.bf16.msra.mxu0 %v1434_v41  ;;  %1462 = vmatpush3.bf16.msra.mxu1 %v1834_v46  ;;  %v779_v41 = vld [vmem:[%s2089_s4 + $0x28] sm:$0xff] }
  0x1e   :  { %1439 = vmatprep.subr.bf16.mxu0 %v1438_v47  ;;  %1463 = vmatprep.subr.bf16.mxu1 %v1677_v2 }
  0x21   :  { %1441 = vmatpush3.bf16.msra.mxu0 %v1438_v47  ;;  %1465 = vmatpush3.bf16.msra.mxu1 %v1844_v50  ;;  %v783_v47 = vld [vmem:[%s2089_s4 + $0x48] sm:$0xff] }
  0x22   :  { %1466 = vmatprep.subr.bf16.mxu0 %v1677_v2  ;;  %1490 = vmatprep.subr.bf16.mxu1 %v1677_v2 }
  0x24   :  { %1084 = vmatmul.mubr.f32.vlgmr.msra.gmra.mrb[0].mxu0 %v24_v51  ;;  %1128 = vmatmul.mubr.f32.vlgmr.msra.gmra.mrb[0].mxu1 %v1679_v4 }
  0x25   :  { %1468 = vmatpush3.bf16.msra.mxu0 %v1736_v9  ;;  %1492 = vmatpush3.bf16.msra.mxu1 %v1736_v9 }
  0x26   :  { %1469 = vmatprep.subr.bf16.mxu0 %v1677_v2  ;;  %1493 = vmatprep.subr.bf16.mxu1 %v1677_v2 }
  0x27   :  { %1197 = vmatprep.mubr.msk.f32.mxu1 %vm1678_vm0, %v1679_v4  ;;  %1086 = vmatprep.mubr.f32.mxu0 %v25_v52 }
  0x28   :  { %1087 = vmatmul.mubr.f32.gmra.mrb[2].mxu0 %v26_v53 }
  0x29   :  { %1471 = vmatpush3.bf16.msra.mxu0 %v1751_v15  ;;  %1495 = vmatpush3.bf16.msra.mxu1 %v1751_v15 }
  0x2a   :  { %1472 = vmatprep.subr.bf16.mxu0 %v1677_v2  ;;  %1496 = vmatprep.subr.bf16.mxu1 %v1677_v2 }
  0x2b   :  { %1089 = vmatprep.mubr.f32.mxu0 %v27_v54  ;;  %v784_v54 = vld [vmem:[%s2089_s4 + $0x50] sm:$0xff] }
  0x2c   :  { %1090 = vmatmul.mubr.f32.gmra.mrb[4].mxu0 %v28_v55  ;;  %v785_v55 = vld [vmem:[%s2089_s4 + $0x58] sm:$0xff] }
  0x2d   :  { %1474 = vmatpush3.bf16.msra.mxu0 %v1767_v21  ;;  %1498 = vmatpush3.bf16.msra.mxu1 %v1767_v21 }
  0x2e   :  { %1475 = vmatprep.subr.bf16.mxu0 %v1677_v2  ;;  %1499 = vmatprep.subr.bf16.mxu1 %v1677_v2 }
  0x2f   :  { %1092 = vmatprep.mubr.f32.mxu0 %v29_v56  ;;  %v1650_v56 = vpack.c.bf16 %v785_v55, %v784_v54 }
  0x30   :  { %1093 = vmatmul.mubr.f32.gmra.mrb[6].mxu0 %v30_v57  ;;  %v786_v57 = vld [vmem:[%s2089_s4 + $0x60] sm:$0xff] }
  0x31   :  { %1477 = vmatpush3.bf16.msra.mxu0 %v1786_v28  ;;  %1501 = vmatpush3.bf16.msra.mxu1 %v1786_v28 }
  0x32   :  { %1478 = vmatprep.subr.bf16.mxu0 %v1677_v2  ;;  %1502 = vmatprep.subr.bf16.mxu1 %v1677_v2 }
  0x33   :  { %1162 = vmatprep.mubr.msk.f32.mxu0 %vm1678_vm0, %v1679_v4 }
  0x35   :  { %1480 = vmatpush3.bf16.msra.mxu0 %v1802_v34  ;;  %1504 = vmatpush3.bf16.msra.mxu1 %v1802_v34 }
  0x36   :  { %1481 = vmatprep.subr.bf16.mxu0 %v1677_v2  ;;  %1505 = vmatprep.subr.bf16.mxu1 %v1677_v2 }
  0x39   :  { %1483 = vmatpush3.bf16.msra.mxu0 %v1818_v40  ;;  %1507 = vmatpush3.bf16.msra.mxu1 %v1818_v40 }
  0x3a   :  { %1484 = vmatprep.subr.bf16.mxu0 %v1677_v2  ;;  %1508 = vmatprep.subr.bf16.mxu1 %v1677_v2 }
  0x3d   :  { %1486 = vmatpush3.bf16.msra.mxu0 %v1834_v46  ;;  %1510 = vmatpush3.bf16.msra.mxu1 %v1834_v46 }
  0x3e   :  { %1487 = vmatprep.subr.bf16.mxu0 %v1677_v2  ;;  %1511 = vmatprep.subr.bf16.mxu1 %v1677_v2 }
  0x41   :  { %1489 = vmatpush3.bf16.msra.mxu0 %v1844_v50  ;;  %1513 = vmatpush3.bf16.msra.mxu1 %v1844_v50 }
  0x42   :  { %1514 = vmatprep.subr.bf16.mxu0 %v1677_v2  ;;  %1538 = vmatprep.subr.bf16.mxu1 %v1677_v2 }
  0xf7   :  { %v1085_v59 = vpop.f32.mrb[0].mxu0  ;;  %v250_v60 = vpop.f32.mrb[0].mxu1 }
  0xf8   :  { %v120_v61 = vpop.f32.mrb[1].mxu0  ;;  %v1129_v62 = vpop.f32.mrb[1].mxu1  ;;  %v126_v11 = vadd.f32 %v1085_v59, %v1911_v58  ;;  %v787_v59 = vld [vmem:[%s2089_s4 + $0x68] sm:$0xff] }
  0xf9   :  { %v121_v63 = vadd.f32 %v1911_v58, %v120_v61  ;;  %v788_v61 = vld [vmem:[%s2089_s4 + $0x70] sm:$0xff]  ;;  %v789_v62 = vld [vmem:[%s2089_s4 + $0x78] sm:$0xff] }
  0xfb   :  { %v254_v0 = vadd.f32 %v250_v60, %v121_v63  ;;  %v1088_v3 = vpop.f32.mrb[2].mxu0  ;;  %v1653_v60 = vpack.c.bf16 %v787_v59, %v786_v57  ;;  %v1656_v63 = vpack.c.bf16 %v789_v62, %v788_v61 }
  0xfc   :  { %v130_v5 = vpop.f32.mrb[3].mxu0  ;;  %v136_v23 = vadd.f32 %v1088_v3, %v1911_v58 }
  0xfd   :  { %1661 = vtanh.f32 %v254_v0  ;;  %v131_v17 = vadd.f32 %v1911_v58, %v130_v5 }
  0xff   :  { %v1932_v6 = vpop.f32.mrb[4].mxu0 }
 0x100   :  { %v1934_v7 = vpop.f32.mrb[5].mxu0 }
 0x101   :  { %v141_v29 = vadd.f32 %v1911_v58, %v1934_v7  ;;  %v873_v7 = vld [vmem:[%s2090_s5] ss:$0 sm:$0xff] }
 0x103   :  { %v1936_v8 = vpop.f32.mrb[6].mxu0 }
 0x104   :  { %v1938_v10 = vpop.f32.mrb[7].mxu0  ;;  %v156_v0 = vadd.f32 %v1936_v8, %v1911_v58 }
 0x105   :  { %v151_v49 = vadd.f32 %v1911_v58, %v1938_v10 }
 0x107   :  { %v1662_v1 = vpop.eup %1661 }
 0x108   :  { %1163 = vmatmul.mubr.f32.vlgmr.msra.gmra.mrb[8].mxu0 %v1662_v1 }
 0x109   :  { %1516 = vmatpush3.bf16.msra.mxu0 %v1736_v9  ;;  %1232 = vmatprep.mubr.msk.f32.mxu0 %vm1678_vm0, %v1679_v4 }
 0x10a   :  { %1517 = vmatprep.subr.bf16.mxu0 %v1677_v2 }
 0x10d   :  { %1519 = vmatpush3.bf16.msra.mxu0 %v1751_v15 }
 0x10e   :  { %1520 = vmatprep.subr.bf16.mxu0 %v1677_v2 }
 0x111   :  { %1522 = vmatpush3.bf16.msra.mxu0 %v1767_v21 }
 0x112   :  { %1523 = vmatprep.subr.bf16.mxu0 %v1677_v2 }
 0x115   :  { %1525 = vmatpush3.bf16.msra.mxu0 %v1786_v28 }
 0x116   :  { %1526 = vmatprep.subr.bf16.mxu0 %v1677_v2 }
 0x119   :  { %1528 = vmatpush3.bf16.msra.mxu0 %v1802_v34 }
 0x11a   :  { %1529 = vmatprep.subr.bf16.mxu0 %v1677_v2 }
 0x11d   :  { %1531 = vmatpush3.bf16.msra.mxu0 %v1818_v40 }
 0x11e   :  { %1532 = vmatprep.subr.bf16.mxu0 %v1677_v2 }
 0x121   :  { %1534 = vmatpush3.bf16.msra.mxu0 %v1834_v46 }
 0x122   :  { %1535 = vmatprep.subr.bf16.mxu0 %v1677_v2 }
 0x125   :  { %1537 = vmatpush3.bf16.msra.mxu0 %v1844_v50 }
 0x126   :  { %1562 = vmatprep.subr.bf16.mxu0 %v1677_v2 }
 0x1db   :  { %v324_v12 = vpop.f32.mrb[8].mxu0 }
 0x1dc   :  { %v328_v13 = vadd.f32 %v324_v12, %v126_v11  ;;  %v1164_v14 = vpop.f32.mrb[9].mxu0 }
 0x1de   :  { %1663 = vtanh.f32 %v328_v13 }
 0x1e8   :  { %v1664_v16 = vpop.eup %1663 }
 0x1e9   :  { %1198 = vmatmul.mubr.f32.vlgmr.msra.gmra.mrb[2].mxu1 %v1664_v16 }
 0x1ea   :  { %1540 = vmatpush3.bf16.msra.mxu1 %v1736_v9  ;;  %1267 = vmatprep.mubr.msk.f32.mxu1 %vm1678_vm0, %v1679_v4 }
 0x1eb   :  { %1541 = vmatprep.subr.bf16.mxu1 %v1677_v2 }
 0x1ee   :  { %1543 = vmatpush3.bf16.msra.mxu1 %v1751_v15 }
 0x1ef   :  { %1544 = vmatprep.subr.bf16.mxu1 %v1677_v2 }
 0x1f2   :  { %1546 = vmatpush3.bf16.msra.mxu1 %v1767_v21 }
 0x1f3   :  { %1547 = vmatprep.subr.bf16.mxu1 %v1677_v2 }
 0x1f6   :  { %1549 = vmatpush3.bf16.msra.mxu1 %v1786_v28 }
 0x1f7   :  { %1550 = vmatprep.subr.bf16.mxu1 %v1677_v2 }
 0x1fa   :  { %1552 = vmatpush3.bf16.msra.mxu1 %v1802_v34 }
 0x1fb   :  { %1553 = vmatprep.subr.bf16.mxu1 %v1677_v2 }
 0x1fe   :  { %1555 = vmatpush3.bf16.msra.mxu1 %v1818_v40 }
 0x1ff   :  { %1556 = vmatprep.subr.bf16.mxu1 %v1677_v2 }
 0x202   :  { %1558 = vmatpush3.bf16.msra.mxu1 %v1834_v46 }
 0x203   :  { %1559 = vmatprep.subr.bf16.mxu1 %v1677_v2 }
 0x206   :  { %1561 = vmatpush3.bf16.msra.mxu1 %v1844_v50 }
 0x207   :  { %1586 = vmatprep.subr.bf16.mxu1 %v1677_v2 }
 0x2bc   :  { %v398_v18 = vpop.f32.mrb[2].mxu1 }
 0x2bd   :  { %v402_v19 = vadd.f32 %v398_v18, %v131_v17  ;;  %v1199_v20 = vpop.f32.mrb[3].mxu1 }
 0x2bf   :  { %1665 = vtanh.f32 %v402_v19 }
 0x2c9   :  { %v1666_v22 = vpop.eup %1665 }
 0x2ca   :  { %1233 = vmatmul.mubr.f32.vlgmr.msra.gmra.mrb[10].mxu0 %v1666_v22 }
 0x2cb   :  { %1564 = vmatpush3.bf16.msra.mxu0 %v1736_v9  ;;  %1302 = vmatprep.mubr.msk.f32.mxu0 %vm1678_vm0, %v1679_v4 }
 0x2cc   :  { %1565 = vmatprep.subr.bf16.mxu0 %v1677_v2 }
 0x2cf   :  { %1567 = vmatpush3.bf16.msra.mxu0 %v1751_v15 }
 0x2d0   :  { %1568 = vmatprep.subr.bf16.mxu0 %v1677_v2 }
 0x2d3   :  { %1570 = vmatpush3.bf16.msra.mxu0 %v1767_v21 }
 0x2d4   :  { %1571 = vmatprep.subr.bf16.mxu0 %v1677_v2 }
 0x2d7   :  { %1573 = vmatpush3.bf16.msra.mxu0 %v1786_v28 }
 0x2d8   :  { %1574 = vmatprep.subr.bf16.mxu0 %v1677_v2 }
 0x2db   :  { %1576 = vmatpush3.bf16.msra.mxu0 %v1802_v34 }
 0x2dc   :  { %1577 = vmatprep.subr.bf16.mxu0 %v1677_v2 }
 0x2df   :  { %1579 = vmatpush3.bf16.msra.mxu0 %v1818_v40 }
 0x2e0   :  { %1580 = vmatprep.subr.bf16.mxu0 %v1677_v2 }
 0x2e3   :  { %1582 = vmatpush3.bf16.msra.mxu0 %v1834_v46 }
 0x2e4   :  { %1583 = vmatprep.subr.bf16.mxu0 %v1677_v2 }
 0x2e7   :  { %1585 = vmatpush3.bf16.msra.mxu0 %v1844_v50 }
 0x2e8   :  { %1610 = vmatprep.subr.bf16.mxu0 %v1677_v2 }
 0x39d   :  { %v472_v24 = vpop.f32.mrb[10].mxu0 }
 0x39e   :  { %v476_v25 = vadd.f32 %v472_v24, %v136_v23  ;;  %v1234_v26 = vpop.f32.mrb[11].mxu0 }
 0x3a0   :  { %1667 = vtanh.f32 %v476_v25 }
 0x3aa   :  { %v1668_v27 = vpop.eup %1667 }
 0x3ab   :  { %1268 = vmatmul.mubr.f32.vlgmr.msra.gmra.mrb[4].mxu1 %v1668_v27 }
 0x3ac   :  { %1588 = vmatpush3.bf16.msra.mxu1 %v1736_v9  ;;  %1337 = vmatprep.mubr.msk.f32.mxu1 %vm1678_vm0, %v1679_v4 }
 0x3ad   :  { %1589 = vmatprep.subr.bf16.mxu1 %v1677_v2 }
 0x3b0   :  { %1591 = vmatpush3.bf16.msra.mxu1 %v1751_v15 }
 0x3b1   :  { %1592 = vmatprep.subr.bf16.mxu1 %v1677_v2 }
 0x3b4   :  { %1594 = vmatpush3.bf16.msra.mxu1 %v1767_v21 }
 0x3b5   :  { %1595 = vmatprep.subr.bf16.mxu1 %v1677_v2 }
 0x3b8   :  { %1597 = vmatpush3.bf16.msra.mxu1 %v1786_v28 }
 0x3b9   :  { %1598 = vmatprep.subr.bf16.mxu1 %v1677_v2 }
 0x3bc   :  { %1600 = vmatpush3.bf16.msra.mxu1 %v1802_v34 }
 0x3bd   :  { %1601 = vmatprep.subr.bf16.mxu1 %v1677_v2 }
 0x3c0   :  { %1603 = vmatpush3.bf16.msra.mxu1 %v1818_v40 }
 0x3c1   :  { %1604 = vmatprep.subr.bf16.mxu1 %v1677_v2 }
 0x3c4   :  { %1606 = vmatpush3.bf16.msra.mxu1 %v1834_v46 }
 0x3c5   :  { %1607 = vmatprep.subr.bf16.mxu1 %v1677_v2 }
 0x3c8   :  { %1609 = vmatpush3.bf16.msra.mxu1 %v1844_v50 }
 0x3c9   :  { %1634 = vmatprep.subr.bf16.mxu1 %v1677_v2 }
 0x47e   :  { %v546_v30 = vpop.f32.mrb[4].mxu1 }
 0x47f   :  { %v550_v31 = vadd.f32 %v546_v30, %v141_v29  ;;  %v1269_v32 = vpop.f32.mrb[5].mxu1 }
 0x481   :  { %1669 = vtanh.f32 %v550_v31 }
 0x48b   :  { %v1670_v33 = vpop.eup %1669 }
 0x48c   :  { %1303 = vmatmul.mubr.f32.vlgmr.msra.gmra.mrb[12].mxu0 %v1670_v33 }
 0x48d   :  { %1612 = vmatpush3.bf16.msra.mxu0 %v1736_v9  ;;  %1372 = vmatprep.mubr.msk.f32.mxu0 %vm1678_vm0, %v1679_v4  ;;  %v146_v9 = vadd.f32 %v1932_v6, %v1911_v58 }
 0x48e   :  { %1613 = vmatprep.subr.bf16.mxu0 %v1677_v2 }
 0x491   :  { %1615 = vmatpush3.bf16.msra.mxu0 %v1751_v15 }
 0x492   :  { %1616 = vmatprep.subr.bf16.mxu0 %v1677_v2 }
 0x495   :  { %1618 = vmatpush3.bf16.msra.mxu0 %v1767_v21 }
 0x496   :  { %1619 = vmatprep.subr.bf16.mxu0 %v1677_v2 }
 0x499   :  { %1621 = vmatpush3.bf16.msra.mxu0 %v1786_v28 }
 0x49a   :  { %1622 = vmatprep.subr.bf16.mxu0 %v1677_v2 }
 0x49d   :  { %1624 = vmatpush3.bf16.msra.mxu0 %v1802_v34 }
 0x49e   :  { %1625 = vmatprep.subr.bf16.mxu0 %v1677_v2 }
 0x4a1   :  { %1627 = vmatpush3.bf16.msra.mxu0 %v1818_v40  ;;  %v1638_v40 = vpack.c.bf16 %v777_v39, %v776_v37 }
 0x4a2   :  { %1628 = vmatprep.subr.bf16.mxu0 %v1677_v2 }
 0x4a5   :  { %1630 = vmatpush3.bf16.msra.mxu0 %v1834_v46  ;;  %v782_v46 = vld [vmem:[%s2089_s4 + $0x40] sm:$0xff] }
 0x4a6   :  { %1631 = vmatprep.subr.bf16.mxu0 %v1677_v2  ;;  %v1647_v48 = vpack.c.bf16 %v783_v47, %v782_v46 }
 0x4a9   :  { %1633 = vmatpush3.bf16.msra.mxu0 %v1844_v50 }
 0x55f   :  { %v620_v15 = vpop.f32.mrb[12].mxu0 }
 0x560   :  { %v624_v21 = vadd.f32 %v620_v15, %v146_v9  ;;  %v1304_v28 = vpop.f32.mrb[13].mxu0 }
 0x562   :  { %1671 = vtanh.f32 %v624_v21 }
 0x56c   :  { %v1672_v34 = vpop.eup %1671 }
 0x56d   :  { %1338 = vmatmul.mubr.f32.vlgmr.msra.gmra.mrb[6].mxu1 %v1672_v34 }
 0x56e   :  { %1407 = vmatprep.mubr.msk.f32.mxu1 %vm1678_vm0, %v1679_v4  ;;  %1636 = vmatpush3.bf16.msra.mxu1 %v1635_v38  ;;  %v778_v4 = vld [vmem:[%s2089_s4 + $0x20] sm:$0xff] }
 0x56f   :  { %1637 = vmatprep.subr.bf16.mxu1 %v1677_v2  ;;  %v1641_v42 = vpack.c.bf16 %v779_v41, %v778_v4 }
 0x572   :  { %1639 = vmatpush3.bf16.msra.mxu1 %v1638_v40 }
 0x573   :  { %1640 = vmatprep.subr.bf16.mxu1 %v1677_v2 }
 0x576   :  { %1642 = vmatpush3.bf16.msra.mxu1 %v1641_v42 }
 0x577   :  { %1643 = vmatprep.subr.bf16.mxu1 %v1677_v2 }
 0x57a   :  { %1645 = vmatpush3.bf16.msra.mxu1 %v1644_v45 }
 0x57b   :  { %1646 = vmatprep.subr.bf16.mxu1 %v1677_v2 }
 0x57e   :  { %1648 = vmatpush3.bf16.msra.mxu1 %v1647_v48 }
 0x57f   :  { %1649 = vmatprep.subr.bf16.mxu1 %v1677_v2 }
 0x582   :  { %1651 = vmatpush3.bf16.msra.mxu1 %v1650_v56 }
 0x583   :  { %1652 = vmatprep.subr.bf16.mxu1 %v1677_v2 }
 0x586   :  { %1654 = vmatpush3.bf16.msra.mxu1 %v1653_v60 }
 0x587   :  { %1655 = vmatprep.subr.bf16.mxu1 %v1677_v2 }
 0x58a   :  { %1657 = vmatpush3.bf16.msra.mxu1 %v1656_v63 }
 0x640   :  { %v694_v50 = vpop.f32.mrb[6].mxu1 }
 0x641   :  { %v698_v51 = vadd.f32 %v694_v50, %v151_v49  ;;  %v1339_v52 = vpop.f32.mrb[7].mxu1 }
 0x643   :  { %1673 = vtanh.f32 %v698_v51 }
 0x64d   :  { %v1674_v53 = vpop.eup %1673 }
 0x64e   :  { %1373 = vmatmul.mubr.f32.vlgmr.msra.gmra.mrb[14].mxu0 %v1674_v53 }
 0x721   :  { %v768_v1 = vpop.f32.mrb[14].mxu0 }
 0x722   :  { %v772_v3 = vadd.f32 %v768_v1, %v156_v0  ;;  %v1374_v5 = vpop.f32.mrb[15].mxu0 }
 0x724   :  { %1675 = vtanh.f32 %v772_v3 }
 0x72e   :  { %v1676_v6 = vpop.eup %1675 }
 0x72f   :  { %1408 = vmatmul.mubr.f32.vlgmr.msra.gmra.mrb[8].mxu1 %v1676_v6 }
 0x802   :  { %v863_v10 = vpop.f32.mrb[8].mxu1 }
 0x803   :  { %v864_v11 = vadd.f32 %v873_v7, %v863_v10  ;;  %v1409_v12 = vpop.f32.mrb[9].mxu1 }
 0x805   :  { %867 = vst [vmem:[%s2091_s6] sm:$0xff] %v864_v11 }

</bundles_post_ra>
